<compile_context>
chip_gen: v5e
topology: v5e:2x2
jax: 0.10.0
libtpu: 0.0.40
codegen_flags: <defaults>
</compile_context>

<pallas_src>
import numpy as np
import jax
import jax.numpy as jnp
from jax.experimental import pallas as pl
from jax.experimental.pallas import tpu as pltpu

# ---- synthetic "config" (small shapes) --------------------------------------
N_TIMESTEPS = 8          # config.N_DIFFUSION_TIMESTEPS
ACTION_DIM  = 8          # config.STRUCTURED_ACTION_FLAT_DIM
OBS_DIM     = 16
HIDDEN      = 32
TEMB_DIM    = 8
BATCH       = 2
MAX_ACTION  = 1.0        # config.MAX_ACTION_CONTINUOUS_PART

LANES = 128              # slab lane width (multiple of 128 -> clean vreg rows)

# ---- slab row layout (all offsets sublane-aligned, i.e. multiples of 8) -----
_R_W1X   = 0
_R_W1T   = _R_W1X + 8
_R_W1S   = _R_W1T + 8
_R_B1    = _R_W1S + 16
_R_W2    = _R_B1 + 8
_R_B2    = _R_W2 + 32
_R_W3    = _R_B2 + 8
_R_B3    = _R_W3 + 32
_R_TEMB  = _R_B3 + 8
_R_SCOND = _R_TEMB + 8
_R_XINIT = _R_SCOND + 8
_R_NOISE = _R_XINIT + 8                    # noise for step i lives at _R_NOISE + 8*i
SLAB_ROWS = _R_NOISE + 8 * N_TIMESTEPS     # 208 rows x 128 lanes x 4 B = 104 KB


# ---- diffusion schedule (vp beta schedule, computed host-side) ---------------
def vp_beta_schedule(T):
    t = np.arange(1, T + 1, dtype=np.float64)
    b_max, b_min = 10.0, 0.1
    alpha = np.exp(-b_min / T - 0.5 * (b_max - b_min) * (2 * t - 1) / T**2)
    return 1.0 - alpha


def make_schedule(T):
    betas = vp_beta_schedule(T)
    alphas = 1.0 - betas
    acp = np.cumprod(alphas)
    acp_prev = np.concatenate([np.ones(1), acp[:-1]])
    sqrt_recip_acp = np.sqrt(1.0 / acp)
    sqrt_recip_acp_m1 = np.sqrt(1.0 / acp - 1.0)
    post_var = np.clip(betas * (1.0 - acp_prev) / (1.0 - acp), 1e-20, None)
    post_logvar = np.log(post_var)
    pm_coef1 = betas * np.sqrt(acp_prev) / (1.0 - acp)
    pm_coef2 = (1.0 - acp_prev) * np.sqrt(alphas) / (1.0 - acp)
    return sqrt_recip_acp, sqrt_recip_acp_m1, pm_coef1, pm_coef2, post_logvar


def sinusoidal_emb(ts, dim):
    half = dim // 2
    freqs = np.exp(-np.log(10000.0) * np.arange(half) / (half - 1))
    ang = ts[:, None].astype(np.float64) * freqs[None, :]
    return np.concatenate([np.sin(ang), np.cos(ang)], axis=-1)


def _pad_block(x, rows):
    """Pad a 2-D piece to (rows, LANES) with zeros (rows is a multiple of 8)."""
    r, c = x.shape
    return jnp.pad(x, ((0, rows - r), (0, LANES - c)))


# ---- wrapper: packs the slab, builds the kernel (schedule baked in) ----------
def diffusion_sample(state_condition, params, noise_init, noise_steps):
    (w1x, w1t, w1s, b1, w2, b2, w3, b3) = params
    T = N_TIMESTEPS
    ts = np.arange(T)[::-1]                       # processing order: t = T-1 .. 0

    srac, sracm1, pm1, pm2, plv = make_schedule(T)
    # Per-step scalar coefficients as compile-time constants (loop is unrolled).
    c_srac   = [float(srac[t])   for t in ts]     # sqrt_recip_alphas_cumprod[t]
    c_sracm1 = [float(sracm1[t]) for t in ts]     # sqrt(1/acp - 1)[t]
    c_pm1    = [float(pm1[t])    for t in ts]     # posterior_mean_coef1[t]
    c_pm2    = [float(pm2[t])    for t in ts]     # posterior_mean_coef2[t]
    # sigma[t] = nonzero_mask * exp(0.5 * posterior_log_variance)  (0.0 at t==0)
    c_sigma  = [float(np.exp(0.5 * plv[t])) if t != 0 else 0.0 for t in ts]

    # Sinusoidal time embeddings for all processed timesteps (T, TEMB).
    temb_all = jnp.asarray(
        sinusoidal_emb(ts.astype(np.float64), TEMB_DIM).astype(np.float32))

    # ---- pack everything into ONE contiguous VMEM slab (single prologue DMA) -
    noise_block = jnp.pad(
        noise_steps.astype(jnp.float32),
        ((0, 0), (0, 8 - BATCH), (0, LANES - ACTION_DIM))).reshape(8 * T, LANES)
    slab = jnp.concatenate(
        [_pad_block(w1x, 8), _pad_block(w1t, 8), _pad_block(w1s, 16),
         _pad_block(b1, 8),  _pad_block(w2, 32), _pad_block(b2, 8),
         _pad_block(w3, 32), _pad_block(b3, 8),  _pad_block(temb_all, 8),
         _pad_block(state_condition, 8), _pad_block(noise_init, 8),
         noise_block],
        axis=0)
    assert slab.shape == (SLAB_ROWS, LANES)

    def kernel(slab_ref, out_ref):
        # ---- unpack (static, sublane-aligned slices; prologue only) ----
        w1x_ = slab_ref[_R_W1X:_R_W1X + ACTION_DIM, 0:HIDDEN]      # (A, H)
        w1t_ = slab_ref[_R_W1T:_R_W1T + TEMB_DIM,   0:HIDDEN]      # (TEMB, H)
        w1s_ = slab_ref[_R_W1S:_R_W1S + OBS_DIM,    0:HIDDEN]      # (OBS, H)
        b1_  = slab_ref[_R_B1:_R_B1 + 1,            0:HIDDEN]      # (1, H)
        w2_  = slab_ref[_R_W2:_R_W2 + HIDDEN,       0:HIDDEN]      # (H, H)
        b2_  = slab_ref[_R_B2:_R_B2 + 1,            0:HIDDEN]      # (1, H)
        w3_  = slab_ref[_R_W3:_R_W3 + HIDDEN,       0:ACTION_DIM]  # (H, A)
        b3_  = slab_ref[_R_B3:_R_B3 + 1,            0:ACTION_DIM]  # (1, A)
        temb = slab_ref[_R_TEMB:_R_TEMB + T,        0:TEMB_DIM]    # (T, TEMB)
        scnd = slab_ref[_R_SCOND:_R_SCOND + BATCH,  0:OBS_DIM]     # (B, OBS)
        x    = slab_ref[_R_XINIT:_R_XINIT + BATCH,  0:ACTION_DIM]  # x_T ~ N(0, I)

        # ---- loop-invariant hoists (computed once, off the per-step chain) ----
        temb_proj = jnp.dot(temb, w1t_, preferred_element_type=jnp.float32)  # (T, H)
        base = jnp.dot(scnd, w1s_, preferred_element_type=jnp.float32) + b1_ # (B, H)
        step_bias = temb_proj[:, None, :] + base[None, :, :]                 # (T, B, H)

        # ---- fully-unrolled reverse-diffusion loop (T static) ----
        for i in range(T):                       # step i processes timestep t = T-1-i
            # noise-prediction model (per-step part only)
            h1 = jnp.maximum(
                jnp.dot(x, w1x_, preferred_element_type=jnp.float32)
                + step_bias[i], 0.0)
            h2 = jnp.maximum(
                jnp.dot(h1, w2_, preferred_element_type=jnp.float32) + b2_, 0.0)
            eps = jnp.dot(h2, w3_, preferred_element_type=jnp.float32) + b3_

            # p_sample step: predict_start_from_noise + clip + q_posterior mean
            x0 = jnp.clip(c_srac[i] * x - c_sracm1[i] * eps,
                          -MAX_ACTION, MAX_ACTION)
            x = c_pm1[i] * x0 + c_pm2[i] * x
            if c_sigma[i] != 0.0:                # t == 0 step has nonzero_mask == 0
                noise_i = slab_ref[_R_NOISE + 8 * i:_R_NOISE + 8 * i + BATCH,
                                   0:ACTION_DIM]
                x = x + c_sigma[i] * noise_i     # sigma folded in-kernel (constant)

        out_ref[...] = jnp.clip(x, -MAX_ACTION, MAX_ACTION)   # final .clamp_ in sample()

    vmem = pl.BlockSpec(memory_space=pltpu.MemorySpace.VMEM)
    return pl.pallas_call(
        kernel,
        out_shape=jax.ShapeDtypeStruct((BATCH, ACTION_DIM), jnp.float32),
        in_specs=[vmem],
        out_specs=vmem,
    )(slab)


def init_params(key):
    ks = jax.random.split(key, 8)
    in_dim = ACTION_DIM + TEMB_DIM + OBS_DIM
    sc1 = 1.0 / np.sqrt(in_dim)
    sc2 = 1.0 / np.sqrt(HIDDEN)
    w1x = jax.random.normal(ks[0], (ACTION_DIM, HIDDEN), jnp.float32) * sc1
    w1t = jax.random.normal(ks[1], (TEMB_DIM, HIDDEN), jnp.float32) * sc1
    w1s = jax.random.normal(ks[2], (OBS_DIM, HIDDEN), jnp.float32) * sc1
    b1  = jnp.zeros((1, HIDDEN), jnp.float32)
    w2  = jax.random.normal(ks[3], (HIDDEN, HIDDEN), jnp.float32) * sc2
    b2  = jnp.zeros((1, HIDDEN), jnp.float32)
    w3  = jax.random.normal(ks[4], (HIDDEN, ACTION_DIM), jnp.float32) * sc2
    b3  = jnp.zeros((1, ACTION_DIM), jnp.float32)
    return (w1x, w1t, w1s, b1, w2, b2, w3, b3)


if __name__ == "__main__":
    key = jax.random.PRNGKey(0)
    k_par, k_obs, k_x0, k_ns = jax.random.split(key, 4)

    params = init_params(k_par)
    state_condition = jax.random.normal(k_obs, (BATCH, OBS_DIM), jnp.float32)
    noise_init  = jax.random.normal(k_x0, (BATCH, ACTION_DIM), jnp.float32)          # x_T
    noise_steps = jax.random.normal(k_ns, (N_TIMESTEPS, BATCH, ACTION_DIM), jnp.float32)

    actions = diffusion_sample(state_condition, params, noise_init, noise_steps)
    actions = jax.block_until_ready(actions)
    assert actions.shape == (BATCH, ACTION_DIM)
    assert bool(jnp.all(jnp.isfinite(actions)))
    assert bool(jnp.all(jnp.abs(actions) <= MAX_ACTION + 1e-6))
    print("KERNEL_OK")
</pallas_src>

<mosaic_0001>
module attributes {stable_mosaic.version = 11 : i64} {
  func.func @kernel(%arg0: memref<208x128xf32, #tpu.memory_space<vmem>>, %arg1: memref<2x8xf32, #tpu.memory_space<vmem>>) attributes {dimension_semantics = [], scalar_prefetch = 0 : i64, scratch_operands = 0 : i64, tpu.core_type = #tpu.core_type<tc>} {
    %c0 = arith.constant 0 : index
    %c0_0 = arith.constant 0 : index
    %0 = vector.load %arg0[%c0, %c0_0] : memref<208x128xf32, #tpu.memory_space<vmem>>, vector<8x32xf32>
    %c8 = arith.constant 8 : index
    %c0_1 = arith.constant 0 : index
    %1 = vector.load %arg0[%c8, %c0_1] : memref<208x128xf32, #tpu.memory_space<vmem>>, vector<8x32xf32>
    %c16 = arith.constant 16 : index
    %c0_2 = arith.constant 0 : index
    %2 = vector.load %arg0[%c16, %c0_2] : memref<208x128xf32, #tpu.memory_space<vmem>>, vector<16x32xf32>
    %c32 = arith.constant 32 : index
    %c0_3 = arith.constant 0 : index
    %3 = vector.load %arg0[%c32, %c0_3] : memref<208x128xf32, #tpu.memory_space<vmem>>, vector<1x32xf32>
    %c40 = arith.constant 40 : index
    %c0_4 = arith.constant 0 : index
    %4 = vector.load %arg0[%c40, %c0_4] : memref<208x128xf32, #tpu.memory_space<vmem>>, vector<32x32xf32>
    %c72 = arith.constant 72 : index
    %c0_5 = arith.constant 0 : index
    %5 = vector.load %arg0[%c72, %c0_5] : memref<208x128xf32, #tpu.memory_space<vmem>>, vector<1x32xf32>
    %c80 = arith.constant 80 : index
    %c0_6 = arith.constant 0 : index
    %6 = vector.load %arg0[%c80, %c0_6] : memref<208x128xf32, #tpu.memory_space<vmem>>, vector<32x8xf32>
    %c112 = arith.constant 112 : index
    %c0_7 = arith.constant 0 : index
    %7 = vector.load %arg0[%c112, %c0_7] : memref<208x128xf32, #tpu.memory_space<vmem>>, vector<1x8xf32>
    %c120 = arith.constant 120 : index
    %c0_8 = arith.constant 0 : index
    %8 = vector.load %arg0[%c120, %c0_8] : memref<208x128xf32, #tpu.memory_space<vmem>>, vector<8x8xf32>
    %c128 = arith.constant 128 : index
    %c0_9 = arith.constant 0 : index
    %9 = vector.load %arg0[%c128, %c0_9] : memref<208x128xf32, #tpu.memory_space<vmem>>, vector<2x16xf32>
    %c136 = arith.constant 136 : index
    %c0_10 = arith.constant 0 : index
    %10 = vector.load %arg0[%c136, %c0_10] : memref<208x128xf32, #tpu.memory_space<vmem>>, vector<2x8xf32>
    %cst = arith.constant dense<0.000000e+00> : vector<8x32xf32>
    %11 = tpu.matmul %8, %1, %cst {dimension_numbers = #tpu.dot_dimension_numbers<[1], [0], [0], [1], [0, 0, 1, 1], [], []>} : vector<8x8xf32>, vector<8x32xf32>, vector<8x32xf32> -> vector<8x32xf32>
    %cst_11 = arith.constant dense<0.000000e+00> : vector<2x32xf32>
    %12 = tpu.matmul %9, %2, %cst_11 {dimension_numbers = #tpu.dot_dimension_numbers<[1], [0], [0], [1], [0, 0, 1, 1], [], []>} : vector<2x16xf32>, vector<16x32xf32>, vector<2x32xf32> -> vector<2x32xf32>
    %13 = vector.broadcast %3 : vector<1x32xf32> to vector<2x32xf32>
    %14 = arith.addf %12, %13 : vector<2x32xf32>
    %15 = vector.shape_cast %11 : vector<8x32xf32> to vector<8x1x32xf32>
    %16 = vector.shape_cast %14 : vector<2x32xf32> to vector<1x2x32xf32>
    %17 = vector.broadcast %15 : vector<8x1x32xf32> to vector<8x2x32xf32>
    %18 = vector.broadcast %16 : vector<1x2x32xf32> to vector<8x2x32xf32>
    %19 = arith.addf %17, %18 : vector<8x2x32xf32>
    %cst_12 = arith.constant dense<0.000000e+00> : vector<2x32xf32>
    %20 = tpu.matmul %10, %0, %cst_12 {dimension_numbers = #tpu.dot_dimension_numbers<[1], [0], [0], [1], [0, 0, 1, 1], [], []>} : vector<2x8xf32>, vector<8x32xf32>, vector<2x32xf32> -> vector<2x32xf32>
    %21 = vector.extract_strided_slice %19 {offsets = [0, 0, 0], sizes = [1, 2, 32], strides = [1, 1, 1]} : vector<8x2x32xf32> to vector<1x2x32xf32>
    %22 = vector.shape_cast %21 : vector<1x2x32xf32> to vector<2x32xf32>
    %23 = arith.addf %20, %22 : vector<2x32xf32>
    %cst_13 = arith.constant 0.000000e+00 : f32
    %24 = vector.broadcast %cst_13 : f32 to vector<2x32xf32>
    %25 = arith.maximumf %23, %24 : vector<2x32xf32>
    %cst_14 = arith.constant dense<0.000000e+00> : vector<2x32xf32>
    %26 = tpu.matmul %25, %4, %cst_14 {dimension_numbers = #tpu.dot_dimension_numbers<[1], [0], [0], [1], [0, 0, 1, 1], [], []>} : vector<2x32xf32>, vector<32x32xf32>, vector<2x32xf32> -> vector<2x32xf32>
    %27 = vector.broadcast %5 : vector<1x32xf32> to vector<2x32xf32>
    %28 = arith.addf %26, %27 : vector<2x32xf32>
    %cst_15 = arith.constant 0.000000e+00 : f32
    %29 = vector.broadcast %cst_15 : f32 to vector<2x32xf32>
    %30 = arith.maximumf %28, %29 : vector<2x32xf32>
    %cst_16 = arith.constant dense<0.000000e+00> : vector<2x8xf32>
    %31 = tpu.matmul %30, %6, %cst_16 {dimension_numbers = #tpu.dot_dimension_numbers<[1], [0], [0], [1], [0, 0, 1, 1], [], []>} : vector<2x32xf32>, vector<32x8xf32>, vector<2x8xf32> -> vector<2x8xf32>
    %32 = vector.broadcast %7 : vector<1x8xf32> to vector<2x8xf32>
    %33 = arith.addf %31, %32 : vector<2x8xf32>
    %cst_17 = arith.constant 12.4908953 : f32
    %34 = vector.broadcast %cst_17 : f32 to vector<2x8xf32>
    %35 = arith.mulf %34, %10 : vector<2x8xf32>
    %cst_18 = arith.constant 12.4508018 : f32
    %36 = vector.broadcast %cst_18 : f32 to vector<2x8xf32>
    %37 = arith.mulf %36, %33 : vector<2x8xf32>
    %38 = arith.subf %35, %37 : vector<2x8xf32>
    %cst_19 = arith.constant -1.000000e+00 : f32
    %cst_20 = arith.constant 1.000000e+00 : f32
    %39 = vector.broadcast %cst_19 : f32 to vector<2x8xf32>
    %40 = arith.maximumf %39, %38 : vector<2x8xf32>
    %41 = vector.broadcast %cst_20 : f32 to vector<2x8xf32>
    %42 = arith.minimumf %41, %40 : vector<2x8xf32>
    %cst_21 = arith.constant 0.0999940708 : f32
    %43 = vector.broadcast %cst_21 : f32 to vector<2x8xf32>
    %44 = arith.mulf %43, %42 : vector<2x8xf32>
    %cst_22 = arith.constant 0.548361063 : f32
    %45 = vector.broadcast %cst_22 : f32 to vector<2x8xf32>
    %46 = arith.mulf %45, %10 : vector<2x8xf32>
    %47 = arith.addf %44, %46 : vector<2x8xf32>
    %c144 = arith.constant 144 : index
    %c0_23 = arith.constant 0 : index
    %48 = vector.load %arg0[%c144, %c0_23] : memref<208x128xf32, #tpu.memory_space<vmem>>, vector<2x8xf32>
    %cst_24 = arith.constant 0.824937343 : f32
    %49 = vector.broadcast %cst_24 : f32 to vector<2x8xf32>
    %50 = arith.mulf %49, %48 : vector<2x8xf32>
    %51 = arith.addf %47, %50 : vector<2x8xf32>
    %cst_25 = arith.constant dense<0.000000e+00> : vector<2x32xf32>
    %52 = tpu.matmul %51, %0, %cst_25 {dimension_numbers = #tpu.dot_dimension_numbers<[1], [0], [0], [1], [0, 0, 1, 1], [], []>} : vector<2x8xf32>, vector<8x32xf32>, vector<2x32xf32> -> vector<2x32xf32>
    %53 = vector.extract_strided_slice %19 {offsets = [1, 0, 0], sizes = [1, 2, 32], strides = [1, 1, 1]} : vector<8x2x32xf32> to vector<1x2x32xf32>
    %54 = vector.shape_cast %53 : vector<1x2x32xf32> to vector<2x32xf32>
    %55 = arith.addf %52, %54 : vector<2x32xf32>
    %cst_26 = arith.constant 0.000000e+00 : f32
    %56 = vector.broadcast %cst_26 : f32 to vector<2x32xf32>
    %57 = arith.maximumf %55, %56 : vector<2x32xf32>
    %cst_27 = arith.constant dense<0.000000e+00> : vector<2x32xf32>
    %58 = tpu.matmul %57, %4, %cst_27 {dimension_numbers = #tpu.dot_dimension_numbers<[1], [0], [0], [1], [0, 0, 1, 1], [], []>} : vector<2x32xf32>, vector<32x32xf32>, vector<2x32xf32> -> vector<2x32xf32>
    %59 = vector.broadcast %5 : vector<1x32xf32> to vector<2x32xf32>
    %60 = arith.addf %58, %59 : vector<2x32xf32>
    %cst_28 = arith.constant 0.000000e+00 : f32
    %61 = vector.broadcast %cst_28 : f32 to vector<2x32xf32>
    %62 = arith.maximumf %60, %61 : vector<2x32xf32>
    %cst_29 = arith.constant dense<0.000000e+00> : vector<2x8xf32>
    %63 = tpu.matmul %62, %6, %cst_29 {dimension_numbers = #tpu.dot_dimension_numbers<[1], [0], [0], [1], [0, 0, 1, 1], [], []>} : vector<2x32xf32>, vector<32x8xf32>, vector<2x8xf32> -> vector<2x8xf32>
    %64 = vector.broadcast %7 : vector<1x8xf32> to vector<2x8xf32>
    %65 = arith.addf %63, %64 : vector<2x8xf32>
    %cst_30 = arith.constant 6.94951487 : f32
    %66 = vector.broadcast %cst_30 : f32 to vector<2x8xf32>
    %67 = arith.mulf %66, %51 : vector<2x8xf32>
    %cst_31 = arith.constant 6.87719107 : f32
    %68 = vector.broadcast %cst_31 : f32 to vector<2x8xf32>
    %69 = arith.mulf %68, %65 : vector<2x8xf32>
    %70 = arith.subf %67, %69 : vector<2x8xf32>
    %cst_32 = arith.constant -1.000000e+00 : f32
    %cst_33 = arith.constant 1.000000e+00 : f32
    %71 = vector.broadcast %cst_32 : f32 to vector<2x8xf32>
    %72 = arith.maximumf %71, %70 : vector<2x8xf32>
    %73 = vector.broadcast %cst_33 : f32 to vector<2x8xf32>
    %74 = arith.minimumf %73, %72 : vector<2x8xf32>
    %cst_34 = arith.constant 0.156120226 : f32
    %75 = vector.broadcast %cst_34 : f32 to vector<2x8xf32>
    %76 = arith.mulf %75, %74 : vector<2x8xf32>
    %cst_35 = arith.constant 0.578640878 : f32
    %77 = vector.broadcast %cst_35 : f32 to vector<2x8xf32>
    %78 = arith.mulf %77, %51 : vector<2x8xf32>
    %79 = arith.addf %76, %78 : vector<2x8xf32>
    %c152 = arith.constant 152 : index
    %c0_36 = arith.constant 0 : index
    %80 = vector.load %arg0[%c152, %c0_36] : memref<208x128xf32, #tpu.memory_space<vmem>>, vector<2x8xf32>
    %cst_37 = arith.constant 0.784093737 : f32
    %81 = vector.broadcast %cst_37 : f32 to vector<2x8xf32>
    %82 = arith.mulf %81, %80 : vector<2x8xf32>
    %83 = arith.addf %79, %82 : vector<2x8xf32>
    %cst_38 = arith.constant dense<0.000000e+00> : vector<2x32xf32>
    %84 = tpu.matmul %83, %0, %cst_38 {dimension_numbers = #tpu.dot_dimension_numbers<[1], [0], [0], [1], [0, 0, 1, 1], [], []>} : vector<2x8xf32>, vector<8x32xf32>, vector<2x32xf32> -> vector<2x32xf32>
    %85 = vector.extract_strided_slice %19 {offsets = [2, 0, 0], sizes = [1, 2, 32], strides = [1, 1, 1]} : vector<8x2x32xf32> to vector<1x2x32xf32>
    %86 = vector.shape_cast %85 : vector<1x2x32xf32> to vector<2x32xf32>
    %87 = arith.addf %84, %86 : vector<2x32xf32>
    %cst_39 = arith.constant 0.000000e+00 : f32
    %88 = vector.broadcast %cst_39 : f32 to vector<2x32xf32>
    %89 = arith.maximumf %87, %88 : vector<2x32xf32>
    %cst_40 = arith.constant dense<0.000000e+00> : vector<2x32xf32>
    %90 = tpu.matmul %89, %4, %cst_40 {dimension_numbers = #tpu.dot_dimension_numbers<[1], [0], [0], [1], [0, 0, 1, 1], [], []>} : vector<2x32xf32>, vector<32x32xf32>, vector<2x32xf32> -> vector<2x32xf32>
    %91 = vector.broadcast %5 : vector<1x32xf32> to vector<2x32xf32>
    %92 = arith.addf %90, %91 : vector<2x32xf32>
    %cst_41 = arith.constant 0.000000e+00 : f32
    %93 = vector.broadcast %cst_41 : f32 to vector<2x32xf32>
    %94 = arith.maximumf %92, %93 : vector<2x32xf32>
    %cst_42 = arith.constant dense<0.000000e+00> : vector<2x8xf32>
    %95 = tpu.matmul %94, %6, %cst_42 {dimension_numbers = #tpu.dot_dimension_numbers<[1], [0], [0], [1], [0, 0, 1, 1], [], []>} : vector<2x32xf32>, vector<32x8xf32>, vector<2x8xf32> -> vector<2x8xf32>
    %96 = vector.broadcast %7 : vector<1x8xf32> to vector<2x8xf32>
    %97 = arith.addf %95, %96 : vector<2x8xf32>
    %cst_43 = arith.constant 4.17739344 : f32
    %98 = vector.broadcast %cst_43 : f32 to vector<2x8xf32>
    %99 = arith.mulf %98, %83 : vector<2x8xf32>
    %cst_44 = arith.constant 4.05593586 : f32
    %100 = vector.broadcast %cst_44 : f32 to vector<2x8xf32>
    %101 = arith.mulf %100, %97 : vector<2x8xf32>
    %102 = arith.subf %99, %101 : vector<2x8xf32>
    %cst_45 = arith.constant -1.000000e+00 : f32
    %cst_46 = arith.constant 1.000000e+00 : f32
    %103 = vector.broadcast %cst_45 : f32 to vector<2x8xf32>
    %104 = arith.maximumf %103, %102 : vector<2x8xf32>
    %105 = vector.broadcast %cst_46 : f32 to vector<2x8xf32>
    %106 = arith.minimumf %105, %104 : vector<2x8xf32>
    %cst_47 = arith.constant 0.226088554 : f32
    %107 = vector.broadcast %cst_47 : f32 to vector<2x8xf32>
    %108 = arith.mulf %107, %106 : vector<2x8xf32>
    %cst_48 = arith.constant 0.595320821 : f32
    %109 = vector.broadcast %cst_48 : f32 to vector<2x8xf32>
    %110 = arith.mulf %109, %83 : vector<2x8xf32>
    %111 = arith.addf %108, %110 : vector<2x8xf32>
    %c160 = arith.constant 160 : index
    %c0_49 = arith.constant 0 : index
    %112 = vector.load %arg0[%c160, %c0_49] : memref<208x128xf32, #tpu.memory_space<vmem>>, vector<2x8xf32>
    %cst_50 = arith.constant 0.728036582 : f32
    %113 = vector.broadcast %cst_50 : f32 to vector<2x8xf32>
    %114 = arith.mulf %113, %112 : vector<2x8xf32>
    %115 = arith.addf %111, %114 : vector<2x8xf32>
    %cst_51 = arith.constant dense<0.000000e+00> : vector<2x32xf32>
    %116 = tpu.matmul %115, %0, %cst_51 {dimension_numbers = #tpu.dot_dimension_numbers<[1], [0], [0], [1], [0, 0, 1, 1], [], []>} : vector<2x8xf32>, vector<8x32xf32>, vector<2x32xf32> -> vector<2x32xf32>
    %117 = vector.extract_strided_slice %19 {offsets = [3, 0, 0], sizes = [1, 2, 32], strides = [1, 1, 1]} : vector<8x2x32xf32> to vector<1x2x32xf32>
    %118 = vector.shape_cast %117 : vector<1x2x32xf32> to vector<2x32xf32>
    %119 = arith.addf %116, %118 : vector<2x32xf32>
    %cst_52 = arith.constant 0.000000e+00 : f32
    %120 = vector.broadcast %cst_52 : f32 to vector<2x32xf32>
    %121 = arith.maximumf %119, %120 : vector<2x32xf32>
    %cst_53 = arith.constant dense<0.000000e+00> : vector<2x32xf32>
    %122 = tpu.matmul %121, %4, %cst_53 {dimension_numbers = #tpu.dot_dimension_numbers<[1], [0], [0], [1], [0, 0, 1, 1], [], []>} : vector<2x32xf32>, vector<32x32xf32>, vector<2x32xf32> -> vector<2x32xf32>
    %123 = vector.broadcast %5 : vector<1x32xf32> to vector<2x32xf32>
    %124 = arith.addf %122, %123 : vector<2x32xf32>
    %cst_54 = arith.constant 0.000000e+00 : f32
    %125 = vector.broadcast %cst_54 : f32 to vector<2x32xf32>
    %126 = arith.maximumf %124, %125 : vector<2x32xf32>
    %cst_55 = arith.constant dense<0.000000e+00> : vector<2x8xf32>
    %127 = tpu.matmul %126, %6, %cst_55 {dimension_numbers = #tpu.dot_dimension_numbers<[1], [0], [0], [1], [0, 0, 1, 1], [], []>} : vector<2x32xf32>, vector<32x8xf32>, vector<2x8xf32> -> vector<2x8xf32>
    %128 = vector.broadcast %7 : vector<1x8xf32> to vector<2x8xf32>
    %129 = arith.addf %127, %128 : vector<2x8xf32>
    %cst_56 = arith.constant 2.71297789 : f32
    %130 = vector.broadcast %cst_56 : f32 to vector<2x8xf32>
    %131 = arith.mulf %130, %115 : vector<2x8xf32>
    %cst_57 = arith.constant 2.52195334 : f32
    %132 = vector.broadcast %cst_57 : f32 to vector<2x8xf32>
    %133 = arith.mulf %132, %129 : vector<2x8xf32>
    %134 = arith.subf %131, %133 : vector<2x8xf32>
    %cst_58 = arith.constant -1.000000e+00 : f32
    %cst_59 = arith.constant 1.000000e+00 : f32
    %135 = vector.broadcast %cst_58 : f32 to vector<2x8xf32>
    %136 = arith.maximumf %135, %134 : vector<2x8xf32>
    %137 = vector.broadcast %cst_59 : f32 to vector<2x8xf32>
    %138 = arith.minimumf %137, %136 : vector<2x8xf32>
    %cst_60 = arith.constant 0.308615416 : f32
    %139 = vector.broadcast %cst_60 : f32 to vector<2x8xf32>
    %140 = arith.mulf %139, %138 : vector<2x8xf32>
    %cst_61 = arith.constant 0.587911367 : f32
    %141 = vector.broadcast %cst_61 : f32 to vector<2x8xf32>
    %142 = arith.mulf %141, %115 : vector<2x8xf32>
    %143 = arith.addf %140, %142 : vector<2x8xf32>
    %c168 = arith.constant 168 : index
    %c0_62 = arith.constant 0 : index
    %144 = vector.load %arg0[%c168, %c0_62] : memref<208x128xf32, #tpu.memory_space<vmem>>, vector<2x8xf32>
    %cst_63 = arith.constant 0.652196824 : f32
    %145 = vector.broadcast %cst_63 : f32 to vector<2x8xf32>
    %146 = arith.mulf %145, %144 : vector<2x8xf32>
    %147 = arith.addf %143, %146 : vector<2x8xf32>
    %cst_64 = arith.constant dense<0.000000e+00> : vector<2x32xf32>
    %148 = tpu.matmul %147, %0, %cst_64 {dimension_numbers = #tpu.dot_dimension_numbers<[1], [0], [0], [1], [0, 0, 1, 1], [], []>} : vector<2x8xf32>, vector<8x32xf32>, vector<2x32xf32> -> vector<2x32xf32>
    %149 = vector.extract_strided_slice %19 {offsets = [4, 0, 0], sizes = [1, 2, 32], strides = [1, 1, 1]} : vector<8x2x32xf32> to vector<1x2x32xf32>
    %150 = vector.shape_cast %149 : vector<1x2x32xf32> to vector<2x32xf32>
    %151 = arith.addf %148, %150 : vector<2x32xf32>
    %cst_65 = arith.constant 0.000000e+00 : f32
    %152 = vector.broadcast %cst_65 : f32 to vector<2x32xf32>
    %153 = arith.maximumf %151, %152 : vector<2x32xf32>
    %cst_66 = arith.constant dense<0.000000e+00> : vector<2x32xf32>
    %154 = tpu.matmul %153, %4, %cst_66 {dimension_numbers = #tpu.dot_dimension_numbers<[1], [0], [0], [1], [0, 0, 1, 1], [], []>} : vector<2x32xf32>, vector<32x32xf32>, vector<2x32xf32> -> vector<2x32xf32>
    %155 = vector.broadcast %5 : vector<1x32xf32> to vector<2x32xf32>
    %156 = arith.addf %154, %155 : vector<2x32xf32>
    %cst_67 = arith.constant 0.000000e+00 : f32
    %157 = vector.broadcast %cst_67 : f32 to vector<2x32xf32>
    %158 = arith.maximumf %156, %157 : vector<2x32xf32>
    %cst_68 = arith.constant dense<0.000000e+00> : vector<2x8xf32>
    %159 = tpu.matmul %158, %6, %cst_68 {dimension_numbers = #tpu.dot_dimension_numbers<[1], [0], [0], [1], [0, 0, 1, 1], [], []>} : vector<2x32xf32>, vector<32x8xf32>, vector<2x8xf32> -> vector<2x8xf32>
    %160 = vector.broadcast %7 : vector<1x8xf32> to vector<2x8xf32>
    %161 = arith.addf %159, %160 : vector<2x8xf32>
    %cst_69 = arith.constant 1.90360606 : f32
    %162 = vector.broadcast %cst_69 : f32 to vector<2x8xf32>
    %163 = arith.mulf %162, %147 : vector<2x8xf32>
    %cst_70 = arith.constant 1.61978889 : f32
    %164 = vector.broadcast %cst_70 : f32 to vector<2x8xf32>
    %165 = arith.mulf %164, %161 : vector<2x8xf32>
    %166 = arith.subf %163, %165 : vector<2x8xf32>
    %cst_71 = arith.constant -1.000000e+00 : f32
    %cst_72 = arith.constant 1.000000e+00 : f32
    %167 = vector.broadcast %cst_71 : f32 to vector<2x8xf32>
    %168 = arith.maximumf %167, %166 : vector<2x8xf32>
    %169 = vector.broadcast %cst_72 : f32 to vector<2x8xf32>
    %170 = arith.minimumf %169, %168 : vector<2x8xf32>
    %cst_73 = arith.constant 0.407037437 : f32
    %171 = vector.broadcast %cst_73 : f32 to vector<2x8xf32>
    %172 = arith.mulf %171, %170 : vector<2x8xf32>
    %cst_74 = arith.constant 0.544265628 : f32
    %173 = vector.broadcast %cst_74 : f32 to vector<2x8xf32>
    %174 = arith.mulf %173, %147 : vector<2x8xf32>
    %175 = arith.addf %172, %174 : vector<2x8xf32>
    %c176 = arith.constant 176 : index
    %c0_75 = arith.constant 0 : index
    %176 = vector.load %arg0[%c176, %c0_75] : memref<208x128xf32, #tpu.memory_space<vmem>>, vector<2x8xf32>
    %cst_76 = arith.constant 0.552576602 : f32
    %177 = vector.broadcast %cst_76 : f32 to vector<2x8xf32>
    %178 = arith.mulf %177, %176 : vector<2x8xf32>
    %179 = arith.addf %175, %178 : vector<2x8xf32>
    %cst_77 = arith.constant dense<0.000000e+00> : vector<2x32xf32>
    %180 = tpu.matmul %179, %0, %cst_77 {dimension_numbers = #tpu.dot_dimension_numbers<[1], [0], [0], [1], [0, 0, 1, 1], [], []>} : vector<2x8xf32>, vector<8x32xf32>, vector<2x32xf32> -> vector<2x32xf32>
    %181 = vector.extract_strided_slice %19 {offsets = [5, 0, 0], sizes = [1, 2, 32], strides = [1, 1, 1]} : vector<8x2x32xf32> to vector<1x2x32xf32>
    %182 = vector.shape_cast %181 : vector<1x2x32xf32> to vector<2x32xf32>
    %183 = arith.addf %180, %182 : vector<2x32xf32>
    %cst_78 = arith.constant 0.000000e+00 : f32
    %184 = vector.broadcast %cst_78 : f32 to vector<2x32xf32>
    %185 = arith.maximumf %183, %184 : vector<2x32xf32>
    %cst_79 = arith.constant dense<0.000000e+00> : vector<2x32xf32>
    %186 = tpu.matmul %185, %4, %cst_79 {dimension_numbers = #tpu.dot_dimension_numbers<[1], [0], [0], [1], [0, 0, 1, 1], [], []>} : vector<2x32xf32>, vector<32x32xf32>, vector<2x32xf32> -> vector<2x32xf32>
    %187 = vector.broadcast %5 : vector<1x32xf32> to vector<2x32xf32>
    %188 = arith.addf %186, %187 : vector<2x32xf32>
    %cst_80 = arith.constant 0.000000e+00 : f32
    %189 = vector.broadcast %cst_80 : f32 to vector<2x32xf32>
    %190 = arith.maximumf %188, %189 : vector<2x32xf32>
    %cst_81 = arith.constant dense<0.000000e+00> : vector<2x8xf32>
    %191 = tpu.matmul %190, %6, %cst_81 {dimension_numbers = #tpu.dot_dimension_numbers<[1], [0], [0], [1], [0, 0, 1, 1], [], []>} : vector<2x32xf32>, vector<32x8xf32>, vector<2x8xf32> -> vector<2x8xf32>
    %192 = vector.broadcast %7 : vector<1x8xf32> to vector<2x8xf32>
    %193 = arith.addf %191, %192 : vector<2x8xf32>
    %cst_82 = arith.constant 1.44310474 : f32
    %194 = vector.broadcast %cst_82 : f32 to vector<2x8xf32>
    %195 = arith.mulf %194, %179 : vector<2x8xf32>
    %cst_83 = arith.constant 1.04045725 : f32
    %196 = vector.broadcast %cst_83 : f32 to vector<2x8xf32>
    %197 = arith.mulf %196, %193 : vector<2x8xf32>
    %198 = arith.subf %195, %197 : vector<2x8xf32>
    %cst_84 = arith.constant -1.000000e+00 : f32
    %cst_85 = arith.constant 1.000000e+00 : f32
    %199 = vector.broadcast %cst_84 : f32 to vector<2x8xf32>
    %200 = arith.maximumf %199, %198 : vector<2x8xf32>
    %201 = vector.broadcast %cst_85 : f32 to vector<2x8xf32>
    %202 = arith.minimumf %201, %200 : vector<2x8xf32>
    %cst_86 = arith.constant 0.535723209 : f32
    %203 = vector.broadcast %cst_86 : f32 to vector<2x8xf32>
    %204 = arith.mulf %203, %202 : vector<2x8xf32>
    %cst_87 = arith.constant 0.447821021 : f32
    %205 = vector.broadcast %cst_87 : f32 to vector<2x8xf32>
    %206 = arith.mulf %205, %179 : vector<2x8xf32>
    %207 = arith.addf %204, %206 : vector<2x8xf32>
    %c184 = arith.constant 184 : index
    %c0_88 = arith.constant 0 : index
    %208 = vector.load %arg0[%c184, %c0_88] : memref<208x128xf32, #tpu.memory_space<vmem>>, vector<2x8xf32>
    %cst_89 = arith.constant 0.424226493 : f32
    %209 = vector.broadcast %cst_89 : f32 to vector<2x8xf32>
    %210 = arith.mulf %209, %208 : vector<2x8xf32>
    %211 = arith.addf %207, %210 : vector<2x8xf32>
    %cst_90 = arith.constant dense<0.000000e+00> : vector<2x32xf32>
    %212 = tpu.matmul %211, %0, %cst_90 {dimension_numbers = #tpu.dot_dimension_numbers<[1], [0], [0], [1], [0, 0, 1, 1], [], []>} : vector<2x8xf32>, vector<8x32xf32>, vector<2x32xf32> -> vector<2x32xf32>
    %213 = vector.extract_strided_slice %19 {offsets = [6, 0, 0], sizes = [1, 2, 32], strides = [1, 1, 1]} : vector<8x2x32xf32> to vector<1x2x32xf32>
    %214 = vector.shape_cast %213 : vector<1x2x32xf32> to vector<2x32xf32>
    %215 = arith.addf %212, %214 : vector<2x32xf32>
    %cst_91 = arith.constant 0.000000e+00 : f32
    %216 = vector.broadcast %cst_91 : f32 to vector<2x32xf32>
    %217 = arith.maximumf %215, %216 : vector<2x32xf32>
    %cst_92 = arith.constant dense<0.000000e+00> : vector<2x32xf32>
    %218 = tpu.matmul %217, %4, %cst_92 {dimension_numbers = #tpu.dot_dimension_numbers<[1], [0], [0], [1], [0, 0, 1, 1], [], []>} : vector<2x32xf32>, vector<32x32xf32>, vector<2x32xf32> -> vector<2x32xf32>
    %219 = vector.broadcast %5 : vector<1x32xf32> to vector<2x32xf32>
    %220 = arith.addf %218, %219 : vector<2x32xf32>
    %cst_93 = arith.constant 0.000000e+00 : f32
    %221 = vector.broadcast %cst_93 : f32 to vector<2x32xf32>
    %222 = arith.maximumf %220, %221 : vector<2x32xf32>
    %cst_94 = arith.constant dense<0.000000e+00> : vector<2x8xf32>
    %223 = tpu.matmul %222, %6, %cst_94 {dimension_numbers = #tpu.dot_dimension_numbers<[1], [0], [0], [1], [0, 0, 1, 1], [], []>} : vector<2x32xf32>, vector<32x8xf32>, vector<2x8xf32> -> vector<2x8xf32>
    %224 = vector.broadcast %7 : vector<1x8xf32> to vector<2x8xf32>
    %225 = arith.addf %223, %224 : vector<2x8xf32>
    %cst_95 = arith.constant 1.18197584 : f32
    %226 = vector.broadcast %cst_95 : f32 to vector<2x8xf32>
    %227 = arith.mulf %226, %211 : vector<2x8xf32>
    %cst_96 = arith.constant 0.630132496 : f32
    %228 = vector.broadcast %cst_96 : f32 to vector<2x8xf32>
    %229 = arith.mulf %228, %225 : vector<2x8xf32>
    %230 = arith.subf %227, %229 : vector<2x8xf32>
    %cst_97 = arith.constant -1.000000e+00 : f32
    %cst_98 = arith.constant 1.000000e+00 : f32
    %231 = vector.broadcast %cst_97 : f32 to vector<2x8xf32>
    %232 = arith.maximumf %231, %230 : vector<2x8xf32>
    %233 = vector.broadcast %cst_98 : f32 to vector<2x8xf32>
    %234 = arith.minimumf %233, %232 : vector<2x8xf32>
    %cst_99 = arith.constant 0.729727566 : f32
    %235 = vector.broadcast %cst_99 : f32 to vector<2x8xf32>
    %236 = arith.mulf %235, %234 : vector<2x8xf32>
    %cst_100 = arith.constant 0.267533898 : f32
    %237 = vector.broadcast %cst_100 : f32 to vector<2x8xf32>
    %238 = arith.mulf %237, %211 : vector<2x8xf32>
    %239 = arith.addf %236, %238 : vector<2x8xf32>
    %c192 = arith.constant 192 : index
    %c0_101 = arith.constant 0 : index
    %240 = vector.load %arg0[%c192, %c0_101] : memref<208x128xf32, #tpu.memory_space<vmem>>, vector<2x8xf32>
    %cst_102 = arith.constant 0.256092787 : f32
    %241 = vector.broadcast %cst_102 : f32 to vector<2x8xf32>
    %242 = arith.mulf %241, %240 : vector<2x8xf32>
    %243 = arith.addf %239, %242 : vector<2x8xf32>
    %cst_103 = arith.constant dense<0.000000e+00> : vector<2x32xf32>
    %244 = tpu.matmul %243, %0, %cst_103 {dimension_numbers = #tpu.dot_dimension_numbers<[1], [0], [0], [1], [0, 0, 1, 1], [], []>} : vector<2x8xf32>, vector<8x32xf32>, vector<2x32xf32> -> vector<2x32xf32>
    %245 = vector.extract_strided_slice %19 {offsets = [7, 0, 0], sizes = [1, 2, 32], strides = [1, 1, 1]} : vector<8x2x32xf32> to vector<1x2x32xf32>
    %246 = vector.shape_cast %245 : vector<1x2x32xf32> to vector<2x32xf32>
    %247 = arith.addf %244, %246 : vector<2x32xf32>
    %cst_104 = arith.constant 0.000000e+00 : f32
    %248 = vector.broadcast %cst_104 : f32 to vector<2x32xf32>
    %249 = arith.maximumf %247, %248 : vector<2x32xf32>
    %cst_105 = arith.constant dense<0.000000e+00> : vector<2x32xf32>
    %250 = tpu.matmul %249, %4, %cst_105 {dimension_numbers = #tpu.dot_dimension_numbers<[1], [0], [0], [1], [0, 0, 1, 1], [], []>} : vector<2x32xf32>, vector<32x32xf32>, vector<2x32xf32> -> vector<2x32xf32>
    %251 = vector.broadcast %5 : vector<1x32xf32> to vector<2x32xf32>
    %252 = arith.addf %250, %251 : vector<2x32xf32>
    %cst_106 = arith.constant 0.000000e+00 : f32
    %253 = vector.broadcast %cst_106 : f32 to vector<2x32xf32>
    %254 = arith.maximumf %252, %253 : vector<2x32xf32>
    %cst_107 = arith.constant dense<0.000000e+00> : vector<2x8xf32>
    %255 = tpu.matmul %254, %6, %cst_107 {dimension_numbers = #tpu.dot_dimension_numbers<[1], [0], [0], [1], [0, 0, 1, 1], [], []>} : vector<2x32xf32>, vector<32x8xf32>, vector<2x8xf32> -> vector<2x8xf32>
    %256 = vector.broadcast %7 : vector<1x8xf32> to vector<2x8xf32>
    %257 = arith.addf %255, %256 : vector<2x8xf32>
    %cst_108 = arith.constant 1.04594612 : f32
    %258 = vector.broadcast %cst_108 : f32 to vector<2x8xf32>
    %259 = arith.mulf %258, %243 : vector<2x8xf32>
    %cst_109 = arith.constant 0.306599617 : f32
    %260 = vector.broadcast %cst_109 : f32 to vector<2x8xf32>
    %261 = arith.mulf %260, %257 : vector<2x8xf32>
    %262 = arith.subf %259, %261 : vector<2x8xf32>
    %cst_110 = arith.constant -1.000000e+00 : f32
    %cst_111 = arith.constant 1.000000e+00 : f32
    %263 = vector.broadcast %cst_110 : f32 to vector<2x8xf32>
    %264 = arith.maximumf %263, %262 : vector<2x8xf32>
    %265 = vector.broadcast %cst_111 : f32 to vector<2x8xf32>
    %266 = arith.minimumf %265, %264 : vector<2x8xf32>
    %cst_112 = arith.constant 1.000000e+00 : f32
    %267 = vector.broadcast %cst_112 : f32 to vector<2x8xf32>
    %268 = arith.mulf %267, %266 : vector<2x8xf32>
    %cst_113 = arith.constant 0.000000e+00 : f32
    %269 = vector.broadcast %cst_113 : f32 to vector<2x8xf32>
    %270 = arith.mulf %269, %243 : vector<2x8xf32>
    %271 = arith.addf %268, %270 : vector<2x8xf32>
    %cst_114 = arith.constant -1.000000e+00 : f32
    %cst_115 = arith.constant 1.000000e+00 : f32
    %272 = vector.broadcast %cst_114 : f32 to vector<2x8xf32>
    %273 = arith.maximumf %272, %271 : vector<2x8xf32>
    %274 = vector.broadcast %cst_115 : f32 to vector<2x8xf32>
    %275 = arith.minimumf %274, %273 : vector<2x8xf32>
    %c0_116 = arith.constant 0 : index
    %c0_117 = arith.constant 0 : index
    %276 = vector.load %arg1[%c0_116, %c0_117] : memref<2x8xf32, #tpu.memory_space<vmem>>, vector<2x8xf32>
    tpu.vector_store %arg1[%c0_116, %c0_117], %275 {strides = array<i32>} : memref<2x8xf32, #tpu.memory_space<vmem>>, vector<2x8xf32>,
    return
  }
}

</mosaic_0001>

<bundles_post_ra>
// kernel: tpu_custom_call.1
= control target key start
LH: loop header
LB: loop body
LE: loop exit
PB: predicated region body
PF: predicated region fallthrough
CT: control target
= control target key end

     0   :  { %6 = vsyncpa [#allocation3], 0  ;;  %s1074_s0 = inlined_call_operand.hbm [shape: f32[208,128], index: 0, kind: input, shape index: {}]   ;;  %s1075_s1 = inlined_call_operand.hbm [shape: f32[2,8], index: 1, kind: output, shape index: {}]  }
   0x1   :  { %7 = vsyncpa [#allocation4], 0  ;;  %s12_s8 = sshll.u32 %s1074_s0, 4  ;;  %s894_s9 = smov [#allocation2]   ;;  %s13_s8 = int_to_ptr.hbm [resolvable:$true] %s12_s8 }
   0x2   :  { %s14_s10 = sshll.u32 %s894_s9, 4  ;;  %s895_s11 = smov 128   ;;  %s15_s10 = int_to_ptr.vmem [resolvable:$true] %s14_s10 }
   0x3   :  { %s896_s12 = smov 8  }
   0x4   :  { %20 = dma.hbm_to_vmem [thread:$0]  %s13_s8, 3328, %s15_s10, [#allocation3], %s895_s11, %s895_s11, %s896_s12  }
   0x5   :  { %890 = dma.done.wait [#allocation3], 3328  }
   0x6   :  { %891 = vsyncadd [#allocation3], 4294963968  ;;  %vm43_vm0 = vcmask 64512   ;;  %v26_v0 = vld [vmem:[#allocation2 + $0x8] sm:$0xff]  ;;  %v28_v1 = vld [vmem:[#allocation2 + $0x18] sm:$0xff]  ;;  %vm68_vm1 = vcmask 130048  }
   0x7   :  { %v911_v2 = vld [vmem:[#allocation2] sm:$0xff]  ;;  %62 = vmatpush.msra.mxu0 %v26_v0  ;;  %86 = vmatpush.msra.mxu1 %v28_v1  ;;  %v40_v3 = vld [vmem:[#allocation2 + $0x78] sm:$0xff]  ;;  %v913_v4 = vld [vmem:[#allocation2 + $0x88] sm:$0x3]  ;;  %vm149_vm2 = vcmask 261120   ;;  %s897_s0 = smov [#allocation5]  }
   0x8   :  { %v27_v5 = vld [vmem:[#allocation2 + $0x10] sm:$0xff]  ;;  %142 = vmatpush.msra.mxu2 %v911_v2  ;;  %800 = vmatmul.msk.f32.vlgmr.msra.gmra.mxu0 %vm43_vm0, %v40_v3  ;;  %v41_v6 = vld [vmem:[#allocation2 + $0x80] sm:$0x3]  ;;  %v925_v8 = vld [vmem:[#allocation2 + $0x38] sm:$0xff]  ;;  %v198_v30 = vmul.f32 12.490895, %v913_v4 }
   0x9   :  { %802 = vmatmul.msk.f32.vlgmr.msra.gmra.mxu2 %vm43_vm0, %v913_v4  ;;  %87 = vmatpush.msra.mxu1 %v27_v5  ;;  %v920_v7 = vld [vmem:[#allocation2 + $0x40] sm:$0xff]  ;;  %v929_v9 = vld [vmem:[#allocation2 + $0x30] sm:$0xff]  ;;  %v934_v10 = vld [vmem:[#allocation2 + $0x28] sm:$0xff]  ;;  %v204_v35 = vmul.f32 0.54836106, %v913_v4  ;;  %s788_s13 = sshll.u32 %s897_s0, 4  ;;  %s789_s13 = int_to_ptr.vmem [resolvable:$true] %s788_s13 }
   0xa   :  { %801 = vmatmul.msk.f32.vlgmr.msra.gmra.mxu1 %vm68_vm1, %v41_v6  ;;  %227 = vmatpush.msrb.mxu2 %v911_v2  ;;  %v939_v11 = vld [vmem:[#allocation2 + $0x68] sm:$0xff]  ;;  %v941_v12 = vld [vmem:[#allocation2 + $0x60] sm:$0xff]  ;;  %v957_v22 = vld [vmem:[#allocation2 + $0x58] sm:$0xff]  ;;  %s790_s16 = sshll.u32 %s1075_s1, 4  ;;  %vm781_vm3 = vcmask 58368   ;;  %s791_s16 = int_to_ptr.hbm [resolvable:$true] %s790_s16 }
   0xb   :  { %165 = vmatpush.msra.mxu3 %v920_v7  ;;  %248 = vmatpush.msrb.mxu1 %v920_v7  ;;  %v839_v13 = vld [vmem:[#allocation2 + $0x20] ss:$0 sm:$0xff]  ;;  %v961_v23 = vld [vmem:[#allocation2 + $0x50] sm:$0xff]  ;;  %v969_v24 = vld [vmem:[#allocation2 + $0x48] ss:$0 sm:$0xff] }
   0xc   :  { %330 = vmatpush.msra.mxu2 %v920_v7  ;;  %190 = vmatpush.msrb.mxu0 %v939_v11  ;;  %v977_v28 = vld [vmem:[#allocation2 + $0x70] ss:$0 sm:$0xff]  ;;  %v288_v55 = vld [vmem:[#allocation2 + $0x98] sm:$0x3] }
   0xd   :  { %166 = vmatpush.msra.mxu3 %v925_v8  ;;  %249 = vmatpush.msrb.mxu1 %v925_v8  ;;  %v206_v34 = vld [vmem:[#allocation2 + $0x90] sm:$0x3]  ;;  %v289_v59 = vmul.f32 0.78409374, %v288_v55 }
   0xe   :  { %331 = vmatpush.msra.mxu2 %v925_v8  ;;  %191 = vmatpush.msrb.mxu0 %v941_v12  ;;  %v207_v38 = vmul.f32 0.82493734, %v206_v34 }
   0xf   :  { %167 = vmatpush.msra.mxu3 %v929_v9  ;;  %250 = vmatpush.msrb.mxu1 %v929_v9 }
  0x10   :  { %332 = vmatpush.msra.mxu2 %v929_v9  ;;  %192 = vmatpush.msrb.mxu0 %v957_v22 }
  0x11   :  { %168 = vmatpush.msra.mxu3 %v934_v10  ;;  %251 = vmatpush.msrb.mxu1 %v934_v10 }
  0x12   :  { %333 = vmatpush.msra.mxu2 %v934_v10  ;;  %193 = vmatpush.msrb.mxu0 %v961_v23 }
  0x13   :  { %272 = vmatpush.msrb.mxu3 %v939_v11  ;;  %354 = vmatpush.msra.mxu1 %v939_v11 }
  0x14   :  { %309 = vmatpush.msra.mxu0 %v911_v2 }
  0x15   :  { %273 = vmatpush.msrb.mxu3 %v941_v12  ;;  %355 = vmatpush.msra.mxu1 %v941_v12 }
  0x17   :  { %274 = vmatpush.msrb.mxu3 %v957_v22  ;;  %356 = vmatpush.msra.mxu1 %v957_v22 }
  0x19   :  { %275 = vmatpush.msrb.mxu3 %v961_v23  ;;  %357 = vmatpush.msra.mxu1 %v961_v23 }
  0x85   :  { %v950_v14 = vpop.f32.mrf.mxu0 }
  0x86   :  { %v100_v15 = vperm.slane %v950_v14, 0  ;;  %v93_v41 = vrot.slane %v950_v14, 1  ;;  %v94_v62 = vrot.slane %v950_v14, 2 }
  0x87   :  { %v89_v16 = vpop.f32.mrf.mxu1 }
  0x88   :  { %v953_v17 = vadd.f32 %v839_v13, %v89_v16  ;;  %v101_v42 = vperm.slane %v93_v41, 0  ;;  %v102_v63 = vperm.slane %v94_v62, 0 }
  0x8a   :  { %v116_v18 = vadd.f32 %v100_v15, %v953_v17  ;;  %v117_v43 = vadd.f32 %v101_v42, %v953_v17  ;;  %v118_v0 = vadd.f32 %v102_v63, %v953_v17 }
  0x8c   :  { %v144_v19 = vpop.f32.mrf.mxu2 }
  0x8d   :  { %v145_v20 = vadd.f32 %v144_v19, %v116_v18 }
  0x8f   :  { %v147_v21 = vmax.f32 %v145_v20, 0.0 }
  0x91   :  { %803 = vmatmul.msk.f32.vlgmr.msra.gmra.mxu3 %vm149_vm2, %v147_v21  ;;  %v370_v21 = vld [vmem:[#allocation2 + $0xa0] sm:$0x3] }
  0x92   :  { %391 = vmatpush.msra.mxu3 %v911_v2 }
 0x114   :  { %v170_v25 = vpop.f32.mrf.mxu3 }
 0x115   :  { %v171_v26 = vadd.f32 %v969_v24, %v170_v25 }
 0x117   :  { %v173_v27 = vmax.f32 %v171_v26, 0.0 }
 0x119   :  { %804 = vmatmul.msk.f32.vlgmr.msrb.gmra.mxu0 %vm149_vm2, %v173_v27 }
 0x11a   :  { %412 = vmatpush.msrb.mxu0 %v920_v7 }
 0x11c   :  { %413 = vmatpush.msrb.mxu0 %v925_v8 }
 0x11e   :  { %414 = vmatpush.msrb.mxu0 %v929_v9 }
 0x120   :  { %415 = vmatpush.msrb.mxu0 %v934_v10 }
 0x196   :  { %v195_v29 = vpop.f32.mrf.mxu0 }
 0x197   :  { %v196_v31 = vadd.f32 %v977_v28, %v195_v29  ;;  %v371_v29 = vmul.f32 0.7280366, %v370_v21 }
 0x199   :  { %v199_v32 = vmul.f32 12.450802, %v196_v31 }
 0x19b   :  { %v200_v33 = vsub.f32 %v198_v30, %v199_v32  ;;  %v95_v32 = vrot.slane %v950_v14, 3 }
 0x19d   :  { %v805_v36 = vclamps-f32 %v200_v33, 1.0  ;;  %v103_v33 = vperm.slane %v95_v32, 0 }
 0x19f   :  { %v203_v37 = vmul.f32 0.09999407, %v805_v36  ;;  %v119_v34 = vadd.f32 %v103_v33, %v953_v17 }
 0x1a1   :  { %v205_v39 = vadd.f32 %v204_v35, %v203_v37 }
 0x1a3   :  { %v208_v40 = vadd.f32 %v207_v38, %v205_v39 }
 0x1a5   :  { %806 = vmatmul.msk.f32.vlgmr.msrb.gmra.mxu2 %vm43_vm0, %v208_v40  ;;  %v280_v52 = vmul.f32 6.949515, %v208_v40  ;;  %v286_v58 = vmul.f32 0.5786409, %v208_v40 }
 0x1a6   :  { %436 = vmatpush.msrb.mxu2 %v939_v11 }
 0x1a8   :  { %437 = vmatpush.msrb.mxu2 %v941_v12 }
 0x1aa   :  { %438 = vmatpush.msrb.mxu2 %v957_v22 }
 0x1ac   :  { %439 = vmatpush.msrb.mxu2 %v961_v23 }
 0x228   :  { %v229_v44 = vpop.f32.mrf.mxu2 }
 0x229   :  { %v230_v45 = vadd.f32 %v229_v44, %v117_v43 }
 0x22b   :  { %v232_v46 = vmax.f32 %v230_v45, 0.0 }
 0x22d   :  { %807 = vmatmul.msk.f32.vlgmr.msrb.gmra.mxu1 %vm149_vm2, %v232_v46  ;;  %v452_v46 = vld [vmem:[#allocation2 + $0xa8] sm:$0x3] }
 0x22e   :  { %473 = vmatpush.msrb.mxu1 %v911_v2 }
 0x2aa   :  { %v253_v47 = vpop.f32.mrf.mxu1 }
 0x2ab   :  { %v254_v48 = vadd.f32 %v969_v24, %v253_v47 }
 0x2ad   :  { %v256_v49 = vmax.f32 %v254_v48, 0.0 }
 0x2af   :  { %808 = vmatmul.msk.f32.vlgmr.msrb.gmra.mxu3 %vm149_vm2, %v256_v49 }
 0x2b0   :  { %494 = vmatpush.msrb.mxu3 %v920_v7 }
 0x2b2   :  { %495 = vmatpush.msrb.mxu3 %v925_v8 }
 0x2b4   :  { %496 = vmatpush.msrb.mxu3 %v929_v9 }
 0x2b6   :  { %497 = vmatpush.msrb.mxu3 %v934_v10 }
 0x332   :  { %v277_v50 = vpop.f32.mrf.mxu3 }
 0x333   :  { %v278_v51 = vadd.f32 %v977_v28, %v277_v50  ;;  %v453_v50 = vmul.f32 0.6521968, %v452_v46 }
 0x335   :  { %v281_v53 = vmul.f32 6.877191, %v278_v51 }
 0x337   :  { %v282_v54 = vsub.f32 %v280_v52, %v281_v53  ;;  %v96_v53 = vrot.slane %v950_v14, 4 }
 0x339   :  { %v809_v56 = vclamps-f32 %v282_v54, 1.0  ;;  %v104_v54 = vperm.slane %v96_v53, 0 }
 0x33b   :  { %v285_v57 = vmul.f32 0.15612023, %v809_v56  ;;  %v120_v55 = vadd.f32 %v104_v54, %v953_v17 }
 0x33d   :  { %v287_v60 = vadd.f32 %v286_v58, %v285_v57 }
 0x33f   :  { %v290_v61 = vadd.f32 %v289_v59, %v287_v60 }
 0x341   :  { %810 = vmatmul.msk.f32.vlgmr.msra.gmra.mxu0 %vm43_vm0, %v290_v61  ;;  %v362_v18 = vmul.f32 4.1773934, %v290_v61  ;;  %v368_v27 = vmul.f32 0.5953208, %v290_v61 }
 0x342   :  { %518 = vmatpush.msra.mxu0 %v939_v11 }
 0x344   :  { %519 = vmatpush.msra.mxu0 %v941_v12 }
 0x346   :  { %520 = vmatpush.msra.mxu0 %v957_v22 }
 0x348   :  { %521 = vmatpush.msra.mxu0 %v961_v23 }
 0x3be   :  { %v311_v1 = vpop.f32.mrf.mxu0 }
 0x3bf   :  { %v312_v3 = vadd.f32 %v311_v1, %v118_v0 }
 0x3c1   :  { %v314_v4 = vmax.f32 %v312_v3, 0.0  ;;  %v534_v3 = vld [vmem:[#allocation2 + $0xb0] sm:$0x3] }
 0x3c3   :  { %811 = vmatmul.msk.f32.vlgmr.msra.gmra.mxu2 %vm149_vm2, %v314_v4 }
 0x3c4   :  { %555 = vmatpush.msra.mxu2 %v911_v2 }
 0x446   :  { %v335_v5 = vpop.f32.mrf.mxu2 }
 0x447   :  { %v336_v6 = vadd.f32 %v969_v24, %v335_v5 }
 0x449   :  { %v338_v13 = vmax.f32 %v336_v6, 0.0 }
 0x44b   :  { %812 = vmatmul.msk.f32.vlgmr.msra.gmra.mxu1 %vm149_vm2, %v338_v13  ;;  %v535_v13 = vmul.f32 0.5525766, %v534_v3 }
 0x44c   :  { %576 = vmatpush.msra.mxu1 %v920_v7 }
 0x44e   :  { %577 = vmatpush.msra.mxu1 %v925_v8 }
 0x450   :  { %578 = vmatpush.msra.mxu1 %v929_v9 }
 0x452   :  { %579 = vmatpush.msra.mxu1 %v934_v10 }
 0x4c8   :  { %v359_v15 = vpop.f32.mrf.mxu1 }
 0x4c9   :  { %v360_v16 = vadd.f32 %v977_v28, %v359_v15 }
 0x4cb   :  { %v363_v19 = vmul.f32 4.055936, %v360_v16 }
 0x4cd   :  { %v364_v20 = vsub.f32 %v362_v18, %v363_v19 }
 0x4cf   :  { %v813_v25 = vclamps-f32 %v364_v20, 1.0 }
 0x4d1   :  { %v367_v26 = vmul.f32 0.22608855, %v813_v25 }
 0x4d3   :  { %v369_v30 = vadd.f32 %v368_v27, %v367_v26  ;;  %v616_v27 = vld [vmem:[#allocation2 + $0xb8] sm:$0x3] }
 0x4d4   :  { %v617_v32 = vmul.f32 0.4242265, %v616_v27 }
 0x4d5   :  { %v372_v31 = vadd.f32 %v371_v29, %v369_v30 }
 0x4d7   :  { %814 = vmatmul.msk.f32.vlgmr.msra.gmra.mxu3 %vm43_vm0, %v372_v31  ;;  %v444_v43 = vmul.f32 2.712978, %v372_v31  ;;  %v450_v49 = vmul.f32 0.58791137, %v372_v31 }
 0x4d8   :  { %600 = vmatpush.msra.mxu3 %v939_v11 }
 0x4da   :  { %601 = vmatpush.msra.mxu3 %v941_v12 }
 0x4dc   :  { %602 = vmatpush.msra.mxu3 %v957_v22 }
 0x4de   :  { %603 = vmatpush.msra.mxu3 %v961_v23 }
 0x55a   :  { %v393_v35 = vpop.f32.mrf.mxu3 }
 0x55b   :  { %v394_v36 = vadd.f32 %v393_v35, %v119_v34  ;;  %v98_v35 = vrot.slane %v950_v14, 6 }
 0x55d   :  { %v396_v37 = vmax.f32 %v394_v36, 0.0  ;;  %v106_v36 = vperm.slane %v98_v35, 0 }
 0x55f   :  { %815 = vmatmul.msk.f32.vlgmr.msrb.gmra.mxu0 %vm149_vm2, %v396_v37  ;;  %v122_v37 = vadd.f32 %v106_v36, %v953_v17 }
 0x560   :  { %637 = vmatpush.msrb.mxu0 %v911_v2 }
 0x5dc   :  { %v417_v38 = vpop.f32.mrf.mxu0 }
 0x5dd   :  { %v418_v39 = vadd.f32 %v969_v24, %v417_v38 }
 0x5df   :  { %v420_v40 = vmax.f32 %v418_v39, 0.0 }
 0x5e1   :  { %816 = vmatmul.msk.f32.vlgmr.msrb.gmra.mxu2 %vm149_vm2, %v420_v40 }
 0x5e2   :  { %658 = vmatpush.msrb.mxu2 %v920_v7 }
 0x5e4   :  { %659 = vmatpush.msrb.mxu2 %v925_v8 }
 0x5e6   :  { %660 = vmatpush.msrb.mxu2 %v929_v9 }
 0x5e8   :  { %661 = vmatpush.msrb.mxu2 %v934_v10 }
 0x664   :  { %v441_v41 = vpop.f32.mrf.mxu2 }
 0x665   :  { %v442_v42 = vadd.f32 %v977_v28, %v441_v41 }
 0x667   :  { %v445_v44 = vmul.f32 2.5219533, %v442_v42 }
 0x669   :  { %v446_v45 = vsub.f32 %v444_v43, %v445_v44 }
 0x66b   :  { %v817_v47 = vclamps-f32 %v446_v45, 1.0 }
 0x66d   :  { %v449_v48 = vmul.f32 0.30861542, %v817_v47 }
 0x66f   :  { %v451_v51 = vadd.f32 %v450_v49, %v449_v48  ;;  %v698_v49 = vld [vmem:[#allocation2 + $0xc0] sm:$0x3] }
 0x670   :  { %v699_v53 = vmul.f32 0.2560928, %v698_v49 }
 0x671   :  { %v454_v52 = vadd.f32 %v453_v50, %v451_v51 }
 0x673   :  { %818 = vmatmul.msk.f32.vlgmr.msrb.gmra.mxu1 %vm43_vm0, %v454_v52  ;;  %v526_v0 = vmul.f32 1.903606, %v454_v52  ;;  %v532_v6 = vmul.f32 0.5442656, %v454_v52 }
 0x674   :  { %682 = vmatpush.msrb.mxu1 %v939_v11 }
 0x676   :  { %683 = vmatpush.msrb.mxu1 %v941_v12 }
 0x678   :  { %684 = vmatpush.msrb.mxu1 %v957_v22 }
 0x67a   :  { %685 = vmatpush.msrb.mxu1 %v961_v23 }
 0x6f0   :  { %v475_v56 = vpop.f32.mrf.mxu1 }
 0x6f1   :  { %v476_v57 = vadd.f32 %v475_v56, %v120_v55  ;;  %v99_v56 = vrot.slane %v950_v14, 7 }
 0x6f3   :  { %v478_v58 = vmax.f32 %v476_v57, 0.0  ;;  %v107_v57 = vperm.slane %v99_v56, 0 }
 0x6f5   :  { %819 = vmatmul.msk.f32.vlgmr.msrb.gmra.mxu3 %vm149_vm2, %v478_v58  ;;  %v123_v58 = vadd.f32 %v107_v57, %v953_v17 }
 0x6f6   :  { %719 = vmatpush.msrb.mxu3 %v911_v2 }
 0x778   :  { %v499_v59 = vpop.f32.mrf.mxu3 }
 0x779   :  { %v500_v60 = vadd.f32 %v969_v24, %v499_v59 }
 0x77b   :  { %v502_v61 = vmax.f32 %v500_v60, 0.0 }
 0x77d   :  { %820 = vmatmul.msk.f32.vlgmr.msra.gmra.mxu0 %vm149_vm2, %v502_v61 }
 0x77e   :  { %740 = vmatpush.msra.mxu0 %v920_v7  ;;  %v97_v7 = vrot.slane %v950_v14, 5 }
 0x780   :  { %741 = vmatpush.msra.mxu0 %v925_v8  ;;  %v105_v8 = vperm.slane %v97_v7, 0 }
 0x782   :  { %742 = vmatpush.msra.mxu0 %v929_v9  ;;  %v121_v9 = vadd.f32 %v105_v8, %v953_v17 }
 0x784   :  { %743 = vmatpush.msra.mxu0 %v934_v10 }
 0x7fa   :  { %v523_v62 = vpop.f32.mrf.mxu0 }
 0x7fb   :  { %v524_v63 = vadd.f32 %v977_v28, %v523_v62 }
 0x7fd   :  { %v527_v1 = vmul.f32 1.6197889, %v524_v63 }
 0x7ff   :  { %v528_v2 = vsub.f32 %v526_v0, %v527_v1 }
 0x801   :  { %v821_v4 = vclamps-f32 %v528_v2, 1.0 }
 0x803   :  { %v531_v5 = vmul.f32 0.40703744, %v821_v4 }
 0x805   :  { %v533_v15 = vadd.f32 %v532_v6, %v531_v5 }
 0x807   :  { %v536_v16 = vadd.f32 %v535_v13, %v533_v15 }
 0x809   :  { %822 = vmatmul.msk.f32.vlgmr.msra.gmra.mxu2 %vm43_vm0, %v536_v16  ;;  %v614_v31 = vmul.f32 0.44782102, %v536_v16 }
 0x80a   :  { %764 = vmatpush.msra.mxu2 %v939_v11 }
 0x80c   :  { %765 = vmatpush.msra.mxu2 %v941_v12 }
 0x80e   :  { %766 = vmatpush.msra.mxu2 %v957_v22 }
 0x810   :  { %767 = vmatpush.msra.mxu2 %v961_v23  ;;  %v608_v23 = vmul.f32 1.4431047, %v536_v16 }
 0x88c   :  { %v557_v10 = vpop.f32.mrf.mxu2 }
 0x88d   :  { %v558_v18 = vadd.f32 %v557_v10, %v121_v9 }
 0x88f   :  { %v560_v19 = vmax.f32 %v558_v18, 0.0 }
 0x891   :  { %823 = vmatmul.msk.f32.vlgmr.msra.gmra.mxu1 %vm149_vm2, %v560_v19 }
 0x90e   :  { %v581_v20 = vpop.f32.mrf.mxu1 }
 0x90f   :  { %v582_v21 = vadd.f32 %v969_v24, %v581_v20 }
 0x911   :  { %v584_v11 = vmax.f32 %v582_v21, 0.0 }
 0x913   :  { %824 = vmatmul.msk.f32.vlgmr.msra.gmra.mxu3 %vm149_vm2, %v584_v11 }
 0x996   :  { %v605_v12 = vpop.f32.mrf.mxu3 }
 0x997   :  { %v606_v22 = vadd.f32 %v977_v28, %v605_v12 }
 0x999   :  { %v609_v25 = vmul.f32 1.0404572, %v606_v22 }
 0x99b   :  { %v610_v26 = vsub.f32 %v608_v23, %v609_v25 }
 0x99d   :  { %v825_v29 = vclamps-f32 %v610_v26, 1.0 }
 0x99f   :  { %v613_v30 = vmul.f32 0.5357232, %v825_v29 }
 0x9a1   :  { %v615_v33 = vadd.f32 %v614_v31, %v613_v30 }
 0x9a3   :  { %v618_v34 = vadd.f32 %v617_v32, %v615_v33 }
 0x9a5   :  { %826 = vmatmul.msk.f32.vlgmr.msrb.gmra.mxu0 %vm43_vm0, %v618_v34  ;;  %v690_v46 = vmul.f32 1.1819758, %v618_v34  ;;  %v696_v52 = vmul.f32 0.2675339, %v618_v34 }
 0xa22   :  { %v639_v38 = vpop.f32.mrf.mxu0 }
 0xa23   :  { %v640_v39 = vadd.f32 %v639_v38, %v122_v37 }
 0xa25   :  { %v642_v40 = vmax.f32 %v640_v39, 0.0 }
 0xa27   :  { %827 = vmatmul.msk.f32.vlgmr.msrb.gmra.mxu2 %vm149_vm2, %v642_v40 }
 0xaaa   :  { %v663_v41 = vpop.f32.mrf.mxu2 }
 0xaab   :  { %v664_v42 = vadd.f32 %v969_v24, %v663_v41 }
 0xaad   :  { %v666_v43 = vmax.f32 %v664_v42, 0.0 }
 0xaaf   :  { %828 = vmatmul.msk.f32.vlgmr.msrb.gmra.mxu1 %vm149_vm2, %v666_v43 }
 0xb2c   :  { %v687_v44 = vpop.f32.mrf.mxu1 }
 0xb2d   :  { %v688_v45 = vadd.f32 %v977_v28, %v687_v44 }
 0xb2f   :  { %v691_v47 = vmul.f32 0.6301325, %v688_v45 }
 0xb31   :  { %v692_v48 = vsub.f32 %v690_v46, %v691_v47 }
 0xb33   :  { %v829_v50 = vclamps-f32 %v692_v48, 1.0 }
 0xb35   :  { %v695_v51 = vmul.f32 0.72972757, %v829_v50 }
 0xb37   :  { %v697_v54 = vadd.f32 %v696_v52, %v695_v51 }
 0xb39   :  { %v700_v55 = vadd.f32 %v699_v53, %v697_v54 }
 0xb3b   :  { %830 = vmatmul.msk.f32.vlgmr.msrb.gmra.mxu3 %vm43_vm0, %v700_v55  ;;  %v772_v3 = vmul.f32 1.0459461, %v700_v55  ;;  %v777_v6 = vmul.f32 0.0, %v700_v55 }
 0xbbe   :  { %v721_v59 = vpop.f32.mrf.mxu3 }
 0xbbf   :  { %v722_v60 = vadd.f32 %v721_v59, %v123_v58 }
 0xbc1   :  { %v724_v61 = vmax.f32 %v722_v60, 0.0 }
 0xbc3   :  { %831 = vmatmul.msk.f32.vlgmr.msra.gmra.mxu0 %vm149_vm2, %v724_v61 }
 0xc40   :  { %v745_v62 = vpop.f32.mrf.mxu0 }
 0xc41   :  { %v746_v63 = vadd.f32 %v969_v24, %v745_v62 }
 0xc43   :  { %v748_v0 = vmax.f32 %v746_v63, 0.0 }
 0xc45   :  { %832 = vmatmul.msk.f32.vlgmr.msra.gmra.mxu2 %vm149_vm2, %v748_v0 }
 0xcc8   :  { %v769_v1 = vpop.f32.mrf.mxu2 }
 0xcc9   :  { %v770_v2 = vadd.f32 %v977_v28, %v769_v1 }
 0xccb   :  { %v773_v4 = vmul.f32 0.30659962, %v770_v2 }
 0xccd   :  { %v774_v14 = vsub.f32 %v772_v3, %v773_v4 }
 0xccf   :  { %v833_v5 = vclamps-f32 %v774_v14, 1.0 }
 0xcd1   :  { %v778_v17 = vadd.f32 %v833_v5, %v777_v6 }
 0xcd3   :  { %v834_v24 = vclamps-f32 %v778_v17, 1.0 }
 0xcd5   :  { %782 = vst.msk [vmem:[#allocation5] sm:$0x3] %vm781_vm3, %v834_v24 }
 0xcd6   :  { %793 = dma.vmem_to_hbm [thread:$0]  %s789_s13, 32, %s791_s16, [#allocation4]  }
 0xcd7   :  { %892 = dma.done.wait [#allocation4], 32  }
 0xcd8   :  { %893 = vsyncadd [#allocation4], 4294967264 }
 0xcd9   :  { %798 = vsyncpa [#allocation3], 1 }
 0xcda   :  { %799 = vsyncpa [#allocation4], 1 }

</bundles_post_ra>
